<compile_context>
chip_gen: v7x
topology: tpu7x:2x2x1
jax: 0.10.0
libtpu: 0.0.40
codegen_flags: <defaults>
</compile_context>

<pallas_src>
import jax
import jax.numpy as jnp
from jax.experimental import pallas as pl
from jax.experimental.pallas import tpu as pltpu

# ---------------- small deterministic config (constructor args of Dual_Embedder_SEP) ---------
BATCH = 2
N_CLASSES = 5              # n_classes (default)
EMBED_DIM = 32             # embed_dim
ENC_CHANNELS = EMBED_DIM   # VAE-encoder output channels; C == embed_dim is required by torch.cat
ENC_H = ENC_W = 7          # AvgPool2d(kernel_size=7) -> 1x1 spatial, matching out.view(B, 1, -1)
KEYS = ("image", "class_label")


# ---------------- fused kernel: AvgPool2d(7) + Embedding gather + concat ----------------------
def _make_dual_embedder_kernel(B, n_classes):
    def kernel(cls_ref, feat_ref, emb_tab_ref, o_ref):
        # cls_ref     : (B,) int32 SMEM (scalar-prefetch)
        # feat_ref    : (B, C, 49) f32 VMEM -- encoder feature map, channels on sublanes,
        #               spatial positions on lanes
        # emb_tab_ref : (n_classes, D) f32 VMEM -- full (tiny) embedding table
        # o_ref       : (B, 2, D) f32 VMEM -- whole-batch output slab, written once

        # AvgPool2d(kernel_size=7) on a 7x7 map == mean over the 49 spatial positions:
        # a single lane-axis reduction over the whole batch at once.
        pooled = jnp.mean(feat_ref[...], axis=-1)                     # (B, C)

        # B is a static Python constant -> this loop fully unrolls.
        for b in range(B):
            # row 0: pooled encoder features (out.view(B, 1, -1))
            o_ref[b, 0:1, :] = pooled[b:b + 1, :]
            # row 1: nn.Embedding(cls_lab) — dynamic-row gather from the VMEM table.
            # Clamp: VMEM refs have no runtime OOB check (PyTorch's Embedding would raise).
            label = jnp.clip(cls_ref[b], 0, n_classes - 1)
            o_ref[b, 1:2, :] = emb_tab_ref[pl.ds(label, 1), :]
    return kernel


def dual_embedder_sep_forward(batch, emb_table, keys=KEYS):
    feat = batch[keys[0]]          # TODO(synk): stands in for self.model(img) -- see header comment.
    cls_lab = batch[keys[1]]       # (B,) int32 ; [:, None] / .view in torch are pure reshapes.

    B, C, H, W = feat.shape
    n_classes, D = emb_table.shape
    assert H == 7 and W == 7, "AvgPool2d(7) + view(B,1,-1) + cat implies a single 7x7 window"
    assert C == D, "torch.cat along dim=1 requires encoder channels == embed_dim"

    # Free, contiguous reshape (no transpose, no extra device op / HBM round-trip).
    feat_flat = feat.reshape(B, C, H * W)
    cls_lab = cls_lab.astype(jnp.int32)

    grid_spec = pltpu.PrefetchScalarGridSpec(
        num_scalar_prefetch=1,          # class labels land in SMEM before the grid runs
        grid=(1,),                      # single step: whole batch fits trivially in VMEM
        in_specs=[
            pl.BlockSpec((B, C, H * W), lambda i, cls: (0, 0, 0)),   # whole-batch feature slab
            pl.BlockSpec((n_classes, D), lambda i, cls: (0, 0)),     # whole (tiny) table resident
        ],
        out_specs=pl.BlockSpec((B, 2, D), lambda i, cls: (0, 0, 0)),  # one coalesced writeback
    )

    return pl.pallas_call(
        _make_dual_embedder_kernel(B, n_classes),
        out_shape=jax.ShapeDtypeStruct((B, 2, D), jnp.float32),
        grid_spec=grid_spec,
        compiler_params=pltpu.CompilerParams(
            dimension_semantics=("arbitrary",),   # single step; no cross-core split of tiny work
        ),
    )(cls_lab, feat_flat, emb_table)


# ---------------- demo / self-check ------------------------------------------------------------
if __name__ == "__main__":
    key = jax.random.PRNGKey(0)
    k_feat, k_lab, k_emb = jax.random.split(key, 3)

    # Encoder-output feature map stand-in (see TODO above), class labels, embedding weight.
    feat = jax.random.normal(k_feat, (BATCH, ENC_CHANNELS, ENC_H, ENC_W), dtype=jnp.float32)
    cls_lab = jax.random.randint(k_lab, (BATCH,), 0, N_CLASSES, dtype=jnp.int32)
    emb_table = jax.random.normal(k_emb, (N_CLASSES, EMBED_DIM), dtype=jnp.float32)

    batch = {KEYS[0]: feat, KEYS[1]: cls_lab}
    fin_emb = dual_embedder_sep_forward(batch, emb_table)
    fin_emb = jax.block_until_ready(fin_emb)

    assert fin_emb.shape == (BATCH, 2, EMBED_DIM), fin_emb.shape
    assert fin_emb.dtype == jnp.float32, fin_emb.dtype
    assert bool(jnp.all(jnp.isfinite(fin_emb)))

    # Pure-JAX reference of the same forward.
    ref_pool = jnp.mean(feat.reshape(BATCH, ENC_CHANNELS, -1), axis=-1)        # AvgPool2d(7) + view
    ref_emb = emb_table[cls_lab]                                               # Embedding + view
    ref = jnp.concatenate([ref_pool[:, None, :], ref_emb[:, None, :]], axis=1)
    assert bool(jnp.allclose(fin_emb, ref, atol=1e-5, rtol=1e-5))

    print("KERNEL_OK")
</pallas_src>

<mosaic_0001>
module attributes {stable_mosaic.version = 11 : i64} {
  func.func @kernel(%arg0: i32, %arg1: memref<2xi32, #tpu.memory_space<smem>>, %arg2: memref<2x32x49xf32, #tpu.memory_space<vmem>>, %arg3: memref<5x32xf32, #tpu.memory_space<vmem>>, %arg4: memref<2x2x32xf32, #tpu.memory_space<vmem>>) attributes {dimension_semantics = [#tpu.dimension_semantics<arbitrary>], iteration_bounds = array<i64: 1>, scalar_prefetch = 1 : i64, scratch_operands = 0 : i64, tpu.core_type = #tpu.core_type<tc>, window_params = [{pipeline_mode = #tpu.pipeline_mode<synchronous>, transform_indices = @transform_0, window_bounds = array<i64: 2, 32, 49>}, {pipeline_mode = #tpu.pipeline_mode<synchronous>, transform_indices = @transform_1, window_bounds = array<i64: 5, 32>}, {pipeline_mode = #tpu.pipeline_mode<synchronous>, transform_indices = @transform_2, window_bounds = array<i64: 2, 2, 32>}]} {
    %c0 = arith.constant 0 : index
    %c0_0 = arith.constant 0 : index
    %c0_1 = arith.constant 0 : index
    %0 = vector.load %arg2[%c0, %c0_0, %c0_1] : memref<2x32x49xf32, #tpu.memory_space<vmem>>, vector<2x32x49xf32>
    %cst = arith.constant dense<0.000000e+00> : vector<2x32xf32>
    %1 = vector.multi_reduction <add>, %0, %cst [2] : vector<2x32x49xf32> to vector<2x32xf32>
    %cst_2 = arith.constant 4.900000e+01 : f32
    %2 = vector.broadcast %cst_2 : f32 to vector<2x32xf32>
    %3 = arith.divf %1, %2 : vector<2x32xf32>
    %4 = vector.extract_strided_slice %3 {offsets = [0, 0], sizes = [1, 32], strides = [1, 1]} : vector<2x32xf32> to vector<1x32xf32>
    %c0_3 = arith.constant 0 : index
    %c0_4 = arith.constant 0 : index
    %c0_5 = arith.constant 0 : index
    %5 = vector.load %arg4[%c0_3, %c0_4, %c0_5] : memref<2x2x32xf32, #tpu.memory_space<vmem>>, vector<1x1x32xf32>
    %6 = vector.shape_cast %5 : vector<1x1x32xf32> to vector<1x32xf32>
    %7 = vector.shape_cast %4 : vector<1x32xf32> to vector<1x1x32xf32>
    tpu.vector_store %arg4[%c0_3, %c0_4, %c0_5], %7 {strides = array<i32>} : memref<2x2x32xf32, #tpu.memory_space<vmem>>, vector<1x1x32xf32>,
    %c0_6 = arith.constant 0 : index
    %8 = memref.load %arg1[%c0_6] : memref<2xi32, #tpu.memory_space<smem>>
    %c0_i32 = arith.constant 0 : i32
    %c4_i32 = arith.constant 4 : i32
    %9 = arith.maxsi %c0_i32, %8 : i32
    %10 = arith.minsi %c4_i32, %9 : i32
    %11 = arith.index_cast %10 : i32 to index
    %c0_7 = arith.constant 0 : index
    %12 = vector.load %arg3[%11, %c0_7] : memref<5x32xf32, #tpu.memory_space<vmem>>, vector<1x32xf32>
    %c0_8 = arith.constant 0 : index
    %c1 = arith.constant 1 : index
    %c0_9 = arith.constant 0 : index
    %13 = vector.load %arg4[%c0_8, %c1, %c0_9] : memref<2x2x32xf32, #tpu.memory_space<vmem>>, vector<1x1x32xf32>
    %14 = vector.shape_cast %13 : vector<1x1x32xf32> to vector<1x32xf32>
    %15 = vector.shape_cast %12 : vector<1x32xf32> to vector<1x1x32xf32>
    tpu.vector_store %arg4[%c0_8, %c1, %c0_9], %15 {strides = array<i32>} : memref<2x2x32xf32, #tpu.memory_space<vmem>>, vector<1x1x32xf32>,
    %16 = vector.extract_strided_slice %3 {offsets = [1, 0], sizes = [1, 32], strides = [1, 1]} : vector<2x32xf32> to vector<1x32xf32>
    %c1_10 = arith.constant 1 : index
    %c0_11 = arith.constant 0 : index
    %c0_12 = arith.constant 0 : index
    %17 = vector.load %arg4[%c1_10, %c0_11, %c0_12] : memref<2x2x32xf32, #tpu.memory_space<vmem>>, vector<1x1x32xf32>
    %18 = vector.shape_cast %17 : vector<1x1x32xf32> to vector<1x32xf32>
    %19 = vector.shape_cast %16 : vector<1x32xf32> to vector<1x1x32xf32>
    tpu.vector_store %arg4[%c1_10, %c0_11, %c0_12], %19 {strides = array<i32>} : memref<2x2x32xf32, #tpu.memory_space<vmem>>, vector<1x1x32xf32>,
    %c1_13 = arith.constant 1 : index
    %20 = memref.load %arg1[%c1_13] : memref<2xi32, #tpu.memory_space<smem>>
    %c0_i32_14 = arith.constant 0 : i32
    %c4_i32_15 = arith.constant 4 : i32
    %21 = arith.maxsi %c0_i32_14, %20 : i32
    %22 = arith.minsi %c4_i32_15, %21 : i32
    %23 = arith.index_cast %22 : i32 to index
    %c0_16 = arith.constant 0 : index
    %24 = vector.load %arg3[%23, %c0_16] : memref<5x32xf32, #tpu.memory_space<vmem>>, vector<1x32xf32>
    %c1_17 = arith.constant 1 : index
    %c1_18 = arith.constant 1 : index
    %c0_19 = arith.constant 0 : index
    %25 = vector.load %arg4[%c1_17, %c1_18, %c0_19] : memref<2x2x32xf32, #tpu.memory_space<vmem>>, vector<1x1x32xf32>
    %26 = vector.shape_cast %25 : vector<1x1x32xf32> to vector<1x32xf32>
    %27 = vector.shape_cast %24 : vector<1x32xf32> to vector<1x1x32xf32>
    tpu.vector_store %arg4[%c1_17, %c1_18, %c0_19], %27 {strides = array<i32>} : memref<2x2x32xf32, #tpu.memory_space<vmem>>, vector<1x1x32xf32>,
    return
  }
  func.func @transform_0(%arg0: i32, %arg1: memref<2xi32, #tpu.memory_space<smem>>) -> (i32, i32, i32) {
    %c0_i32 = arith.constant 0 : i32
    %c0_i32_0 = arith.constant 0 : i32
    %c0_i32_1 = arith.constant 0 : i32
    %c0_i32_2 = arith.constant 0 : i32
    return %c0_i32, %c0_i32_0, %c0_i32_1 : i32, i32, i32
  }
  func.func @transform_1(%arg0: i32, %arg1: memref<2xi32, #tpu.memory_space<smem>>) -> (i32, i32) {
    %c0_i32 = arith.constant 0 : i32
    %c0_i32_0 = arith.constant 0 : i32
    %c0_i32_1 = arith.constant 0 : i32
    return %c0_i32, %c0_i32_0 : i32, i32
  }
  func.func @transform_2(%arg0: i32, %arg1: memref<2xi32, #tpu.memory_space<smem>>) -> (i32, i32, i32) {
    %c0_i32 = arith.constant 0 : i32
    %c0_i32_0 = arith.constant 0 : i32
    %c0_i32_1 = arith.constant 0 : i32
    %c0_i32_2 = arith.constant 0 : i32
    return %c0_i32, %c0_i32_0, %c0_i32_1 : i32, i32, i32
  }
}

</mosaic_0001>

<bundles_post_ra>
// kernel: tpu_custom_call.1
= control target key start
LH: loop header
LB: loop body
LE: loop exit
PB: predicated region body
PF: predicated region fallthrough
CT: control target
= control target key end

     0   :  { %s378_s0 = inlined_call_operand.hbm [shape: s32[2], index: 0, kind: input, shape index: {}]   ;;  %s379_s1 = inlined_call_operand.hbm [shape: f32[2,32,49], index: 1, kind: input, shape index: {}]   ;;  %s380_s2 = inlined_call_operand.hbm [shape: f32[5,32], index: 2, kind: input, shape index: {}]   ;;  %s381_s3 = inlined_call_operand.hbm [shape: f32[2,2,32], index: 3, kind: output, shape index: {}]  }
   0x1   :  { %s204_s14 = scalar_lea.hbm %s378_s0, 16 }
   0x2   :  { %p205_p0 = scmp.ne.s32.totalorder %s378_s0, %s204_s14  ;;  %p208_p1 = scmp.lt.u32.totalorder %s204_s14, %s378_s0 }
   0x4   :  { %p210_p2 = pnand %p208_p1, %p205_p0 }
   0x6   :  { %213 = shalt.err (!%p210_p2)  }
   0x7   :  { %s288_s19 = smov [#allocation3]  }
   0x8   :  { %9 = dma.hbm_to_smem %s378_s0, 16, %s288_s19, [#allocation2] }
   0x9   :  { %280 = dma.done.wait [#allocation2], 16 }
   0xa   :  { %281 = vsyncadd [#allocation2], 4294967280 }
   0xb   :  { %11 = sfence }
   0xc   :  { %12 = vsyncpa [#allocation5], 0 }
   0xd   :  { %13 = vsyncpa [#allocation8], 0 }
   0xe   :  { %14 = vsyncpa [#allocation6], 0  ;;  %s289_s22 = smov [#allocation4]   ;;  %s214_s26 = scalar_lea.hbm %s379_s1, 1024 }
   0xf   :  { %s20_s23 = sshll.u32 %s289_s22, 4  ;;  %p215_p3 = scmp.ne.s32.totalorder %s379_s1, %s214_s26  ;;  %s21_s23 = int_to_ptr.vmem [resolvable:$true] %s20_s23 }
  0x10   :  { %p218_p4 = scmp.lt.u32.totalorder %s214_s26, %s379_s1 }
  0x12   :  { %p220_p5 = pnand %p218_p4, %p215_p3 }
  0x14   :  { %223 = shalt.err (!%p220_p5)
}
  0x15   :  { %s224_s0 = scalar_lea.vmem %s21_s23, 1024  ;;  %p229_p7 = scmp.lt.s32.totalorder %s21_s23, %s21_s23 }
  0x16   :  { %p225_p6 = scmp.ne.s32.totalorder %s21_s23, %s224_s0  ;;  %p230_p8 = scmp.lt.s32.totalorder %s224_s0, %s224_s0 }
  0x18   :  { %p231_p9 = por %p230_p8, %p229_p7 }
  0x1a   :  { %p232_p10 = pnand %p231_p9, %p225_p6 }
  0x1c   :  { %235 = shalt.err (!%p232_p10)
}
  0x1d   :  { %s290_s4 = smov 128   ;;  %s291_s5 = smov 8  }
  0x1e   :  { %26 = dma.hbm_to_vmem [thread:$0]  %s379_s1, 1024, %s21_s23, [#allocation5], %s290_s4, %s290_s4, %s291_s5  }
  0x1f   :  { %s292_s8 = smov [#allocation7]   ;;  %s236_s12 = scalar_lea.hbm %s380_s2, 128 }
  0x20   :  { %s33_s9 = sshll.u32 %s292_s8, 4  ;;  %p237_p11 = scmp.ne.s32.totalorder %s380_s2, %s236_s12  ;;  %s34_s9 = int_to_ptr.vmem [resolvable:$true] %s33_s9 }
  0x21   :  { %p240_p12 = scmp.lt.u32.totalorder %s236_s12, %s380_s2 }
  0x23   :  { %p242_p13 = pnand %p240_p12, %p237_p11 }
  0x25   :  { %245 = shalt.err (!%p242_p13)
}
  0x26   :  { %s246_s17 = scalar_lea.vmem %s34_s9, 128  ;;  %p251_p1 = scmp.lt.s32.totalorder %s34_s9, %s34_s9 }
  0x27   :  { %p247_p0 = scmp.ne.s32.totalorder %s34_s9, %s246_s17  ;;  %p252_p2 = scmp.lt.s32.totalorder %s246_s17, %s246_s17 }
  0x29   :  { %p253_p3 = por %p252_p2, %p251_p1 }
  0x2b   :  { %p254_p4 = pnand %p253_p3, %p247_p0 }
  0x2d   :  { %257 = shalt.err (!%p254_p4)
}
  0x2e   :  { %36 = dma.hbm_to_vmem [thread:$0]  %s380_s2, 128, %s34_s9, [#allocation8]  }
  0x2f   :  { %282 = dma.done.wait [#allocation5], 1024  }
  0x30   :  { %283 = vsyncadd [#allocation5], 4294966272 }
  0x31   :  { %284 = dma.done.wait [#allocation8], 128  }
  0x32   :  { %285 = vsyncadd [#allocation8], 4294967168  ;;  %vm51_vm0 = vcmask 400384   ;;  %v47_v0 = vld [vmem:[#allocation4 + $0x20] sm:$0xff]  ;;  %v48_v2 = vld [vmem:[#allocation4 + $0x28] sm:$0xff]  ;;  %s119_s2 = sld [smem:[#allocation3]]  ;;  %v89_v18 = vlaneseq }
  0x33   :  { %v43_v1 = vld [vmem:[#allocation4] sm:$0xff]  ;;  %v64_v3 = vsel %vm51_vm0, %v47_v0, 0.0  ;;  %v44_v5 = vld [vmem:[#allocation4 + $0x8] sm:$0xff]  ;;  %v67_v6 = vsel %vm51_vm0, %v48_v2, 0.0  ;;  %v49_v8 = vld [vmem:[#allocation4 + $0x30] sm:$0xff]  ;;  %s186_s19 = sld [smem:[#allocation3 + $0x1]] }
  0x34   :  { %v52_v4 = vsel %vm51_vm0, %v43_v1, 0.0  ;;  %65 = vadd.xlane.f32.xlu1 %v64_v3  ;;  %v55_v7 = vsel %vm51_vm0, %v44_v5, 0.0  ;;  %v45_v9 = vld [vmem:[#allocation4 + $0x10] sm:$0xff]  ;;  %v70_v10 = vsel %vm51_vm0, %v49_v8, 0.0  ;;  %v50_v12 = vld [vmem:[#allocation4 + $0x38] sm:$0xff]  ;;  %vm117_vm1 = vcmask 253952  }
  0x35   :  { %53 = vadd.xlane.f32.xlu0 %v52_v4  ;;  %v58_v11 = vsel %vm51_vm0, %v45_v9, 0.0  ;;  %v46_v13 = vld [vmem:[#allocation4 + $0x18] sm:$0xff]  ;;  %v73_v14 = vsel %vm51_vm0, %v50_v12, 0.0  ;;  %v90_v21 = vand.u32 127, %v89_v18  ;;  %v92_v26 = vshrl.u32 %v89_v18, 7  ;;  %s293_s23 = smov [#allocation9]  }
  0x36   :  { %v61_v15 = vsel %vm51_vm0, %v46_v13, 0.0  ;;  %vm100_vm2 = vcmask 130112   ;;  %vm107_vm3 = vcmask 195712   ;;  %s166_s24 = sshll.u32 %s293_s23, 4  ;;  %vm114_vm4 = vcmask 261312   ;;  %s167_s24 = int_to_ptr.vmem [resolvable:$true] %s166_s24 }
  0x37   :  { %v95_v22 = vadd.s32 4294967288, %v90_v21  ;;  %v102_v25 = vadd.s32 4294967280, %v90_v21  ;;  %v109_v30 = vadd.s32 4294967272, %v90_v21  ;;  %v93_v35 = vsub.s32 %v90_v21, %v92_v26  ;;  %s258_s25 = scalar_lea.vmem %s167_s24, 64  ;;  %p263_p10 = scmp.lt.s32.totalorder %s167_s24, %s167_s24 }
  0x38   :  { %68 = vadd.xlane.f32.xlu1 %v67_v6  ;;  %p120_p5 = scmp.gt.s32.totalorder %s119_s2, 0  ;;  %p181_p7 = scmp.lt.s32.totalorder %s119_s2, 4 }
  0x39   :  { %56 = vadd.xlane.f32.xlu0 %v55_v7  ;;  %p154_p6 = scmp.gt.s32.totalorder %s186_s19, 0  ;;  %p187_p8 = scmp.lt.s32.totalorder %s186_s19, 4  ;;  %v98_v27 = vsub.s32 %v95_v22, %v92_v26  ;;  %v105_v32 = vsub.s32 %v102_v25, %v92_v26  ;;  %v112_v41 = vsub.s32 %v109_v30, %v92_v26 }
  0x3a   :  { %s121_s20 = scalar_select %p120_p5, %s119_s2, 0 }
  0x3b   :  { %s383_s19 = smov (!%p154_p6, %s186_s19), 0  ;;  %p259_p9 = scmp.ne.s32.totalorder %s167_s24, %s258_s25 }
  0x3c   :  { %71 = vadd.xlane.f32.xlu1 %v70_v10  ;;  %s385_s20 = smov (!%p181_p7, %s121_s20), 4  ;;  %s387_s19 = smov (!%p187_p8, %s383_s19), 4 }
  0x3d   :  { %59 = vadd.xlane.f32.xlu0 %v58_v11  ;;  %s124_s21 = scalar_lea.vmem [#allocation7], %s385_s20  ;;  %s158_s22 = scalar_lea.vmem [#allocation7], %s387_s19 }
  0x3e   :  { %v125_v16 = vld [vmem:[%s124_s21] sm:$0x1]  ;;  %p264_p11 = scmp.lt.s32.totalorder %s258_s25, %s258_s25 }
  0x3f   :  { %126 = vst.msk [vmem:[#allocation9 + $0x1] sm:$0x1] %vm117_vm1, %v125_v16  ;;  %v159_v17 = vld [vmem:[%s158_s22] sm:$0x1] }
  0x40   :  { %74 = vadd.xlane.f32.xlu1 %v73_v14  ;;  %160 = vst.msk [vmem:[#allocation9 + $0x3] sm:$0x1] %vm117_vm1, %v159_v17  ;;  %p265_p12 = por %p264_p11, %p263_p10 }
  0x41   :  { %62 = vadd.xlane.f32.xlu0 %v61_v15 }
  0x42   :  { %p266_p13 = pnand %p265_p12, %p259_p9 }
  0xc1   :  { %v66_v19 = vpop.xlane.xlu1 %65 }
  0xc2   :  { %v54_v20 = vpop.xlane.xlu0 %53  ;;  %v81_v31 = vmul.f32 0.020408163, %v66_v19 }
  0xc3   :  { %v77_v36 = vmul.f32 0.020408163, %v54_v20 }
  0xc4   :  { %v134_v46 = vrot.slane %v81_v31, %v93_v35 }
  0xc5   :  { %v69_v23 = vpop.xlane.xlu1 %68  ;;  %v94_v47 = vrot.slane %v77_v36, %v93_v35 }
  0xc6   :  { %v57_v24 = vpop.xlane.xlu0 %56  ;;  %v82_v28 = vmul.f32 0.020408163, %v69_v23 }
  0xc7   :  { %v78_v29 = vmul.f32 0.020408163, %v57_v24 }
  0xc8   :  { %v138_v39 = vrot.slane %v82_v28, %v98_v27 }
  0xc9   :  { %v72_v33 = vpop.xlane.xlu1 %71  ;;  %v99_v40 = vrot.slane %v78_v29, %v98_v27 }
  0xca   :  { %v60_v34 = vpop.xlane.xlu0 %59  ;;  %v83_v37 = vmul.f32 0.020408163, %v72_v33  ;;  %v139_v50 = vsel %vm100_vm2, %v138_v39, %v134_v46 }
  0xcb   :  { %v79_v38 = vmul.f32 0.020408163, %v60_v34  ;;  %v101_v51 = vsel %vm100_vm2, %v99_v40, %v94_v47 }
  0xcc   :  { %v143_v42 = vrot.slane %v83_v37, %v105_v32 }
  0xcd   :  { %v106_v43 = vrot.slane %v79_v38, %v105_v32  ;;  %v75_v44 = vpop.xlane.xlu1 %74 }
  0xce   :  { %v63_v45 = vpop.xlane.xlu0 %62  ;;  %v84_v48 = vmul.f32 0.020408163, %v75_v44  ;;  %v144_v54 = vsel %vm107_vm3, %v143_v42, %v139_v50 }
  0xcf   :  { %v80_v49 = vmul.f32 0.020408163, %v63_v45  ;;  %v108_v55 = vsel %vm107_vm3, %v106_v43, %v101_v51 }
  0xd0   :  { %v148_v52 = vrot.slane %v84_v48, %v112_v41 }
  0xd1   :  { %v113_v53 = vrot.slane %v80_v49, %v112_v41 }
  0xd2   :  { %v149_v56 = vsel %vm114_vm4, %v148_v52, %v144_v54 }
  0xd3   :  { %v115_v57 = vsel %vm114_vm4, %v113_v53, %v108_v55  ;;  %152 = vst.msk [vmem:[#allocation9 + $0x2] sm:$0x1] %vm117_vm1, %v149_v56 }
  0xd4   :  { %118 = vst.msk [vmem:[#allocation9] sm:$0x1] %vm117_vm1, %v115_v57 }
  0xd5   :  { %269 = shalt.err (!%p266_p13)
}
  0xd6   :  { %s270_s28 = scalar_lea.hbm %s381_s3, 64 }
  0xd7   :  { %p271_p0 = scmp.ne.s32.totalorder %s381_s3, %s270_s28  ;;  %p274_p1 = scmp.lt.u32.totalorder %s270_s28, %s381_s3 }
  0xd9   :  { %p276_p2 = pnand %p274_p1, %p271_p0 }
  0xdb   :  { %279 = shalt.err (!%p276_p2)
}
  0xdc   :  { %s294_s5 = smov 32   ;;  %s295_s6 = smov 2  }
  0xdd   :  { %172 = dma.vmem_to_hbm [thread:$0]  %s167_s24, 64, %s381_s3, [#allocation6], %s294_s5, %s294_s5, %s295_s6  }
  0xde   :  { %286 = dma.done.wait [#allocation6], 64  }
  0xdf   :  { %287 = vsyncadd [#allocation6], 4294967232 }
  0xe0   :  { %176 = vsyncpa [#allocation5], 1 }
  0xe1   :  { %177 = vsyncpa [#allocation8], 1 }
  0xe2   :  { %178 = vsyncpa [#allocation6], 1 }

</bundles_post_ra>
